<compile_context>
chip_gen: v5e
topology: v5e:2x2
jax: 0.10.0
libtpu: 0.0.40
codegen_flags: <defaults>
</compile_context>

<pallas_src>
import functools

import jax
import jax.numpy as jnp
from jax.experimental import pallas as pl
from jax.experimental.pallas import tpu as pltpu


# ----------------------------------------------------------------------------
# Config helpers (mirror of the PyTorch module's constructor logic)
# ----------------------------------------------------------------------------
def generate_layer_dims(input_dim, n_layers, n_units, output_dim, structure):
    if structure == "pyramid":
        dims = [max(output_dim, n_units // (2 ** i)) for i in range(n_layers)]
    else:  # "constant" / default / unknown structure -> constant
        dims = [n_units] * n_layers
    return dims + [output_dim]


def _round_up(n, m):
    return ((n + m - 1) // m) * m


# Conservative per-TensorCore VMEM budget: fits v7x's 64 MiB/TC with headroom
# (and is well under the 128 MiB of v5e/v6e).
_VMEM_BUDGET_BYTES = 48 * 1024 * 1024
# v7x has 2 TensorCores per chip; an extra batch tile is harmless on v5e/v6e.
_NUM_TC = 2


# ----------------------------------------------------------------------------
# Fused whole-network kernel.
#   refs = (x_ref, w0, b0, w1, b1, ..., w_{L-1}, b_{L-1}, o_ref)
#   Static Python unroll over layers; activations stay on-chip between layers.
#   BatchNorm is already folded into (w, b); dropout is identity (eval mode).
# ----------------------------------------------------------------------------
def _mlp_fused_kernel(*refs, num_layers, activation, compute_dtype):
    x_ref = refs[0]
    o_ref = refs[-1]
    param_refs = refs[1:1 + 2 * num_layers]

    y = x_ref[...]                              # bf16 input tile
    for li in range(num_layers):
        w = param_refs[2 * li][...]             # bf16 weights, BN folded in
        b = param_refs[2 * li + 1][...]         # f32 folded bias/shift
        # Downcast to bf16 only right before the MXU matmul; accumulate in f32.
        y = jnp.dot(y.astype(compute_dtype), w,
                    preferred_element_type=jnp.float32)
        y = y + b                               # f32 epilogue (bias + BN shift)
        if li < num_layers - 1:
            # Activation in f32 (keeps v5e's f32-only VPU/EUP path happy).
            if activation == "gelu":
                y = jax.nn.gelu(y)
            elif activation == "silu":
                y = y * jax.nn.sigmoid(y)
            else:                               # default: relu
                y = jnp.maximum(y, 0.0)
            # Dropout: identity in eval mode (no-op).
    o_ref[...] = y.astype(o_ref.dtype)


# ----------------------------------------------------------------------------
# Parameter construction: Linear init + eval-mode BN folding + 128-lane padding
# Weights are stored padded in bf16; biases stay f32 (f32 epilogue).
# ----------------------------------------------------------------------------
def init_mlp_params(key, config, *, param_dtype=jnp.bfloat16):
    p = config["params"]
    input_dim = p["input_dim"]
    num_classes = p["num_classes"]
    hidden_dims = generate_layer_dims(
        input_dim, p["n_layers"], p["n_units"], p["output_dim"], p["structure"]
    )
    hidden_dims = hidden_dims[:-1] + [num_classes]

    eps = 1e-5
    layers = []
    prev_dim = input_dim
    for i, h_dim in enumerate(hidden_dims):
        key, kw, kb = jax.random.split(key, 3)
        # deterministic Linear init (Kaiming-uniform-ish bound, like torch default)
        bound = 1.0 / float(prev_dim) ** 0.5
        w = jax.random.uniform(kw, (prev_dim, h_dim), jnp.float32, -bound, bound)
        b = jax.random.uniform(kb, (h_dim,), jnp.float32, -bound, bound)

        is_last = i == len(hidden_dims) - 1
        if (not is_last) and p.get("use_norm", True):
            # BatchNorm1d fresh init: gamma=1, beta=0, running_mean=0, running_var=1
            gamma = jnp.ones((h_dim,), jnp.float32)
            beta = jnp.zeros((h_dim,), jnp.float32)
            running_mean = jnp.zeros((h_dim,), jnp.float32)
            running_var = jnp.ones((h_dim,), jnp.float32)
            scale = gamma / jnp.sqrt(running_var + eps)
            shift = beta - running_mean * scale
        else:
            scale = jnp.ones((h_dim,), jnp.float32)
            shift = jnp.zeros((h_dim,), jnp.float32)

        # Fold eval-mode BN affine into the Linear weights/bias.
        w_f = w * scale[None, :]
        b_f = b * scale + shift

        # Zero-pad feature dims to multiples of 128 (lane-dense, unmasked stores).
        din_pad = _round_up(prev_dim, 128)
        dout_pad = _round_up(h_dim, 128)
        w_pad = jnp.pad(w_f, ((0, din_pad - prev_dim),
                              (0, dout_pad - h_dim))).astype(param_dtype)
        b_pad = jnp.pad(b_f, (0, dout_pad - h_dim)).reshape(1, dout_pad)  # f32

        layers.append(dict(
            w=w_pad, b=b_pad,            # padded, folded  -> kernel inputs
            w_ref=w_f, b_ref=b_f,        # unpadded, folded -> pure-JAX reference
            in_dim=prev_dim, out_dim=h_dim,
        ))
        prev_dim = h_dim

    return {
        "layers": layers,
        "input_dim": input_dim,
        "num_classes": num_classes,
        "activation": (p.get("activation") or "relu").lower(),
    }


# ----------------------------------------------------------------------------
# Tiling / VMEM planning helpers
# ----------------------------------------------------------------------------
def _plan_batch_tiles(B, block_b):
    """Balanced batch tiles: padding waste < 1 sublane group per tile, and at
    least _NUM_TC tiles when the batch is big enough (v7x 2-TC sharding)."""
    b8 = max(_round_up(B, 8), 8)
    n_tiles = pl.cdiv(b8, block_b)
    if b8 // 8 >= _NUM_TC:
        n_tiles = max(n_tiles, _NUM_TC)
    bb = _round_up(pl.cdiv(b8, n_tiles), 8)
    b_pad = _round_up(b8, bb)
    return bb, b_pad


def _vmem_footprint_bytes(bb, layers, din_pad, dout_pad):
    # Params: single-buffered (Buffered(1)), bf16 W + f32 b.
    param_bytes = sum(l["w"].size * l["w"].dtype.itemsize
                      + l["b"].size * l["b"].dtype.itemsize for l in layers)
    x_itemsize = layers[0]["w"].dtype.itemsize
    max_hidden_pad = max(l["w"].shape[1] for l in layers)
    io_bytes = 2 * bb * din_pad * x_itemsize + 2 * bb * dout_pad * 4  # dbl-buffered
    act_bytes = 2 * bb * max_hidden_pad * 4                           # f32 slabs
    return param_bytes + io_bytes + act_bytes


# ----------------------------------------------------------------------------
# Forward pass: one pallas_call for the whole MLP, batch-tiled grid.
# ----------------------------------------------------------------------------
def mlp_classifier_forward(x, params, *, block_b=None, compute_dtype=jnp.bfloat16):
    layers = params["layers"]
    num_layers = len(layers)
    activation = params["activation"]
    num_classes = params["num_classes"]

    B, Din = x.shape
    din_pad = layers[0]["w"].shape[0]
    dout_pad = layers[-1]["w"].shape[1]
    max_pad = max(din_pad, max(l["w"].shape[1] for l in layers))

    if block_b is None:
        # Narrow nets (<=256 lanes) are overhead/HBM-bound: amortize the
        # ~0.35us per-grid-step cost with bigger batch tiles.
        block_b = 2048 if max_pad <= 256 else (1024 if max_pad <= 1024 else 512)

    bb, b_pad = _plan_batch_tiles(B, block_b)
    # VMEM budget check sized for v7x's 64 MiB/TC: bf16 + Buffered(1) params
    # already applied, so shrink the batch tile only if still over budget.
    # (Prefer keeping bb >= 256 so the 2x256^2 MXU on v6e/v7x stays fed.)
    while (_vmem_footprint_bytes(bb, layers, din_pad, dout_pad)
           > _VMEM_BUDGET_BYTES and bb > 8):
        bb = max(_round_up(bb // 2, 8), 8)
        b_pad = _round_up(max(_round_up(B, 8), 8), bb)
    # TODO(synk): if the single-buffered bf16 parameters alone exceed the VMEM
    # budget, stream weights per layer with pltpu.emit_pipeline (and/or fp8
    # weights on v7x) instead of whole-network residency.

    # Pad/cast x only when needed (avoid extra HBM passes for aligned inputs).
    if (b_pad != B) or (din_pad != Din):
        x_in = jnp.pad(x.astype(compute_dtype),
                       ((0, b_pad - B), (0, din_pad - Din)))
    elif x.dtype != compute_dtype:
        x_in = x.astype(compute_dtype)
    else:
        x_in = x

    grid = (b_pad // bb,)

    # BlockSpecs: x/out tiled over batch (default double-buffering); weights and
    # biases are grid-invariant -> single-buffered (half the VMEM) and stay
    # resident across batch tiles.
    in_specs = [pl.BlockSpec((bb, din_pad), lambda i: (i, 0))]
    flat_inputs = [x_in]
    for layer in layers:
        di, do = layer["w"].shape
        in_specs.append(pl.BlockSpec((di, do), lambda i: (0, 0),
                                     pipeline_mode=pl.Buffered(1)))
        in_specs.append(pl.BlockSpec((1, do), lambda i: (0, 0),
                                     pipeline_mode=pl.Buffered(1)))
        flat_inputs.append(layer["w"])
        flat_inputs.append(layer["b"])

    # Advisory cost estimate from the REAL (unpadded) dims and actual dtypes.
    compute_itemsize = layers[0]["w"].dtype.itemsize
    flops = 2 * B * sum(l["in_dim"] * l["out_dim"] for l in layers)
    transcendentals = (B * sum(l["out_dim"] for l in layers[:-1])
                       if activation in ("gelu", "silu") else 0)
    real_param_bytes = sum(l["in_dim"] * l["out_dim"] * compute_itemsize
                           + l["out_dim"] * 4 for l in layers)
    bytes_accessed = (B * Din * compute_itemsize + real_param_bytes
                      + B * num_classes * 4)
    cost = pl.CostEstimate(flops=flops, transcendentals=transcendentals,
                           bytes_accessed=bytes_accessed)

    footprint = _vmem_footprint_bytes(bb, layers, din_pad, dout_pad)
    vmem_limit_bytes = max(int(footprint * 1.25) + (1 << 20), 4 << 20)

    kernel = functools.partial(
        _mlp_fused_kernel,
        num_layers=num_layers,
        activation=activation,
        compute_dtype=compute_dtype,
    )

    out_pad = pl.pallas_call(
        kernel,
        out_shape=jax.ShapeDtypeStruct((b_pad, dout_pad), jnp.float32),
        grid=grid,
        in_specs=in_specs,
        out_specs=pl.BlockSpec((bb, dout_pad), lambda i: (i, 0)),
        compiler_params=pltpu.CompilerParams(
            dimension_semantics=("parallel",),   # batch tiles shard across TCs
            vmem_limit_bytes=vmem_limit_bytes,
        ),
        cost_estimate=cost,
    )(*flat_inputs)

    if b_pad == B and dout_pad == num_classes:
        return out_pad
    return out_pad[:B, :num_classes]


# ----------------------------------------------------------------------------
# Pure-JAX reference (matching bf16-in / f32-accumulate precision).
# ----------------------------------------------------------------------------
def mlp_reference(x, params, compute_dtype=jnp.bfloat16):
    act_map = {
        "relu": lambda v: jnp.maximum(v, 0.0),
        "gelu": jax.nn.gelu,
        "silu": lambda v: v * jax.nn.sigmoid(v),
    }
    act = act_map.get(params["activation"], act_map["relu"])
    layers = params["layers"]
    y = x
    for i, layer in enumerate(layers):
        y = jnp.dot(y.astype(compute_dtype),
                    layer["w_ref"].astype(compute_dtype),
                    preferred_element_type=jnp.float32) + layer["b_ref"]
        if i < len(layers) - 1:
            y = act(y)
    return y


if __name__ == "__main__":
    config = {
        "name": "mlp",
        "params": {
            "input_dim": 32,
            "num_classes": 10,
            "n_layers": 3,
            "n_units": 32,
            "output_dim": 16,
            "structure": "constant",
            "dropout": 0.1,
            "activation": "relu",
            "use_norm": True,
        },
    }

    key = jax.random.PRNGKey(0)
    key, kx = jax.random.split(key)
    B = 8
    x = jax.random.normal(kx, (B, config["params"]["input_dim"]), jnp.float32)

    params = init_mlp_params(key, config)

    out = mlp_classifier_forward(x, params)
    out = jax.block_until_ready(out)

    ref = mlp_reference(x, params)
    assert out.shape == (B, config["params"]["num_classes"])
    # bf16 matmul inputs / f32 accumulate in both paths -> loose-ish tolerance.
    assert jnp.allclose(out, ref, atol=2e-2, rtol=2e-2), "mismatch vs reference"

    print("KERNEL_OK")
</pallas_src>

<mosaic_0001>
module attributes {stable_mosaic.version = 11 : i64} {
  func.func @_mlp_fused_kernel(%arg0: i32, %arg1: memref<8x128xbf16, #tpu.memory_space<vmem>>, %arg2: memref<128x128xbf16, #tpu.memory_space<vmem>>, %arg3: memref<1x128xf32, #tpu.memory_space<vmem>>, %arg4: memref<128x128xbf16, #tpu.memory_space<vmem>>, %arg5: memref<1x128xf32, #tpu.memory_space<vmem>>, %arg6: memref<128x128xbf16, #tpu.memory_space<vmem>>, %arg7: memref<1x128xf32, #tpu.memory_space<vmem>>, %arg8: memref<128x128xbf16, #tpu.memory_space<vmem>>, %arg9: memref<1x128xf32, #tpu.memory_space<vmem>>, %arg10: memref<8x128xf32, #tpu.memory_space<vmem>>) attributes {dimension_semantics = [#tpu.dimension_semantics<parallel>], iteration_bounds = array<i64: 1>, scalar_prefetch = 0 : i64, scratch_operands = 0 : i64, tpu.core_type = #tpu.core_type<tc>, window_params = [{transform_indices = @transform_0, window_bounds = array<i64: 8, 128>}, {pipeline_mode = #tpu.pipeline_mode<synchronous>, transform_indices = @transform_1, window_bounds = array<i64: 128, 128>}, {pipeline_mode = #tpu.pipeline_mode<synchronous>, transform_indices = @transform_2, window_bounds = array<i64: 1, 128>}, {pipeline_mode = #tpu.pipeline_mode<synchronous>, transform_indices = @transform_3, window_bounds = array<i64: 128, 128>}, {pipeline_mode = #tpu.pipeline_mode<synchronous>, transform_indices = @transform_4, window_bounds = array<i64: 1, 128>}, {pipeline_mode = #tpu.pipeline_mode<synchronous>, transform_indices = @transform_5, window_bounds = array<i64: 128, 128>}, {pipeline_mode = #tpu.pipeline_mode<synchronous>, transform_indices = @transform_6, window_bounds = array<i64: 1, 128>}, {pipeline_mode = #tpu.pipeline_mode<synchronous>, transform_indices = @transform_7, window_bounds = array<i64: 128, 128>}, {pipeline_mode = #tpu.pipeline_mode<synchronous>, transform_indices = @transform_8, window_bounds = array<i64: 1, 128>}, {transform_indices = @transform_9, window_bounds = array<i64: 8, 128>}]} {
    %c0 = arith.constant 0 : index
    %c0_0 = arith.constant 0 : index
    %0 = vector.load %arg1[%c0, %c0_0] : memref<8x128xbf16, #tpu.memory_space<vmem>>, vector<8x128xbf16>
    %c0_1 = arith.constant 0 : index
    %c0_2 = arith.constant 0 : index
    %1 = vector.load %arg2[%c0_1, %c0_2] : memref<128x128xbf16, #tpu.memory_space<vmem>>, vector<128x128xbf16>
    %c0_3 = arith.constant 0 : index
    %c0_4 = arith.constant 0 : index
    %2 = vector.load %arg3[%c0_3, %c0_4] : memref<1x128xf32, #tpu.memory_space<vmem>>, vector<1x128xf32>
    %cst = arith.constant dense<0.000000e+00> : vector<8x128xf32>
    %3 = tpu.matmul %0, %1, %cst {dimension_numbers = #tpu.dot_dimension_numbers<[1], [0], [0], [1], [0, 0, 1, 1], [], []>} : vector<8x128xbf16>, vector<128x128xbf16>, vector<8x128xf32> -> vector<8x128xf32>
    %4 = vector.broadcast %2 : vector<1x128xf32> to vector<8x128xf32>
    %5 = arith.addf %3, %4 : vector<8x128xf32>
    %cst_5 = arith.constant 0.000000e+00 : f32
    %6 = vector.broadcast %cst_5 : f32 to vector<8x128xf32>
    %7 = arith.maximumf %5, %6 : vector<8x128xf32>
    %c0_6 = arith.constant 0 : index
    %c0_7 = arith.constant 0 : index
    %8 = vector.load %arg4[%c0_6, %c0_7] : memref<128x128xbf16, #tpu.memory_space<vmem>>, vector<128x128xbf16>
    %c0_8 = arith.constant 0 : index
    %c0_9 = arith.constant 0 : index
    %9 = vector.load %arg5[%c0_8, %c0_9] : memref<1x128xf32, #tpu.memory_space<vmem>>, vector<1x128xf32>
    %10 = arith.truncf %7 : vector<8x128xf32> to vector<8x128xbf16>
    %cst_10 = arith.constant dense<0.000000e+00> : vector<8x128xf32>
    %11 = tpu.matmul %10, %8, %cst_10 {dimension_numbers = #tpu.dot_dimension_numbers<[1], [0], [0], [1], [0, 0, 1, 1], [], []>} : vector<8x128xbf16>, vector<128x128xbf16>, vector<8x128xf32> -> vector<8x128xf32>
    %12 = vector.broadcast %9 : vector<1x128xf32> to vector<8x128xf32>
    %13 = arith.addf %11, %12 : vector<8x128xf32>
    %cst_11 = arith.constant 0.000000e+00 : f32
    %14 = vector.broadcast %cst_11 : f32 to vector<8x128xf32>
    %15 = arith.maximumf %13, %14 : vector<8x128xf32>
    %c0_12 = arith.constant 0 : index
    %c0_13 = arith.constant 0 : index
    %16 = vector.load %arg6[%c0_12, %c0_13] : memref<128x128xbf16, #tpu.memory_space<vmem>>, vector<128x128xbf16>
    %c0_14 = arith.constant 0 : index
    %c0_15 = arith.constant 0 : index
    %17 = vector.load %arg7[%c0_14, %c0_15] : memref<1x128xf32, #tpu.memory_space<vmem>>, vector<1x128xf32>
    %18 = arith.truncf %15 : vector<8x128xf32> to vector<8x128xbf16>
    %cst_16 = arith.constant dense<0.000000e+00> : vector<8x128xf32>
    %19 = tpu.matmul %18, %16, %cst_16 {dimension_numbers = #tpu.dot_dimension_numbers<[1], [0], [0], [1], [0, 0, 1, 1], [], []>} : vector<8x128xbf16>, vector<128x128xbf16>, vector<8x128xf32> -> vector<8x128xf32>
    %20 = vector.broadcast %17 : vector<1x128xf32> to vector<8x128xf32>
    %21 = arith.addf %19, %20 : vector<8x128xf32>
    %cst_17 = arith.constant 0.000000e+00 : f32
    %22 = vector.broadcast %cst_17 : f32 to vector<8x128xf32>
    %23 = arith.maximumf %21, %22 : vector<8x128xf32>
    %c0_18 = arith.constant 0 : index
    %c0_19 = arith.constant 0 : index
    %24 = vector.load %arg8[%c0_18, %c0_19] : memref<128x128xbf16, #tpu.memory_space<vmem>>, vector<128x128xbf16>
    %c0_20 = arith.constant 0 : index
    %c0_21 = arith.constant 0 : index
    %25 = vector.load %arg9[%c0_20, %c0_21] : memref<1x128xf32, #tpu.memory_space<vmem>>, vector<1x128xf32>
    %26 = arith.truncf %23 : vector<8x128xf32> to vector<8x128xbf16>
    %cst_22 = arith.constant dense<0.000000e+00> : vector<8x128xf32>
    %27 = tpu.matmul %26, %24, %cst_22 {dimension_numbers = #tpu.dot_dimension_numbers<[1], [0], [0], [1], [0, 0, 1, 1], [], []>} : vector<8x128xbf16>, vector<128x128xbf16>, vector<8x128xf32> -> vector<8x128xf32>
    %28 = vector.broadcast %25 : vector<1x128xf32> to vector<8x128xf32>
    %29 = arith.addf %27, %28 : vector<8x128xf32>
    %c0_23 = arith.constant 0 : index
    %c0_24 = arith.constant 0 : index
    %30 = vector.load %arg10[%c0_23, %c0_24] : memref<8x128xf32, #tpu.memory_space<vmem>>, vector<8x128xf32>
    tpu.vector_store %arg10[%c0_23, %c0_24], %29 {strides = array<i32>} : memref<8x128xf32, #tpu.memory_space<vmem>>, vector<8x128xf32>,
    return
  }
  func.func @transform_0(%arg0: i32) -> (i32, i32) {
    %c0_i32 = arith.constant 0 : i32
    %c0_i32_0 = arith.constant 0 : i32
    return %arg0, %c0_i32 : i32, i32
  }
  func.func @transform_1(%arg0: i32) -> (i32, i32) {
    %c0_i32 = arith.constant 0 : i32
    %c0_i32_0 = arith.constant 0 : i32
    %c0_i32_1 = arith.constant 0 : i32
    return %c0_i32, %c0_i32_0 : i32, i32
  }
  func.func @transform_2(%arg0: i32) -> (i32, i32) {
    %c0_i32 = arith.constant 0 : i32
    %c0_i32_0 = arith.constant 0 : i32
    %c0_i32_1 = arith.constant 0 : i32
    return %c0_i32, %c0_i32_0 : i32, i32
  }
  func.func @transform_3(%arg0: i32) -> (i32, i32) {
    %c0_i32 = arith.constant 0 : i32
    %c0_i32_0 = arith.constant 0 : i32
    %c0_i32_1 = arith.constant 0 : i32
    return %c0_i32, %c0_i32_0 : i32, i32
  }
  func.func @transform_4(%arg0: i32) -> (i32, i32) {
    %c0_i32 = arith.constant 0 : i32
    %c0_i32_0 = arith.constant 0 : i32
    %c0_i32_1 = arith.constant 0 : i32
    return %c0_i32, %c0_i32_0 : i32, i32
  }
  func.func @transform_5(%arg0: i32) -> (i32, i32) {
    %c0_i32 = arith.constant 0 : i32
    %c0_i32_0 = arith.constant 0 : i32
    %c0_i32_1 = arith.constant 0 : i32
    return %c0_i32, %c0_i32_0 : i32, i32
  }
  func.func @transform_6(%arg0: i32) -> (i32, i32) {
    %c0_i32 = arith.constant 0 : i32
    %c0_i32_0 = arith.constant 0 : i32
    %c0_i32_1 = arith.constant 0 : i32
    return %c0_i32, %c0_i32_0 : i32, i32
  }
  func.func @transform_7(%arg0: i32) -> (i32, i32) {
    %c0_i32 = arith.constant 0 : i32
    %c0_i32_0 = arith.constant 0 : i32
    %c0_i32_1 = arith.constant 0 : i32
    return %c0_i32, %c0_i32_0 : i32, i32
  }
  func.func @transform_8(%arg0: i32) -> (i32, i32) {
    %c0_i32 = arith.constant 0 : i32
    %c0_i32_0 = arith.constant 0 : i32
    %c0_i32_1 = arith.constant 0 : i32
    return %c0_i32, %c0_i32_0 : i32, i32
  }
  func.func @transform_9(%arg0: i32) -> (i32, i32) {
    %c0_i32 = arith.constant 0 : i32
    %c0_i32_0 = arith.constant 0 : i32
    return %arg0, %c0_i32 : i32, i32
  }
}

</mosaic_0001>

<bundles_post_ra>
// kernel: tpu_custom_call.1
= control target key start
LH: loop header
LB: loop body
LE: loop exit
PB: predicated region body
PF: predicated region fallthrough
CT: control target
= control target key end

     0   :  { %14 = vsyncpa [#allocation3], 0  ;;  %s872_s0 = inlined_call_operand.hbm [shape: bf16[8,128], index: 0, kind: input, shape index: {}]   ;;  %s873_s1 = inlined_call_operand.hbm [shape: bf16[128,128], index: 1, kind: input, shape index: {}]   ;;  %s874_s2 = inlined_call_operand.vmem [shape: f32[1,128], index: 2, kind: input, shape index: {}]   ;;  %s875_s3 = inlined_call_operand.hbm [shape: bf16[128,128], index: 3, kind: input, shape index: {}]   ;;  %s876_s4 = inlined_call_operand.vmem [shape: f32[1,128], index: 4, kind: input, shape index: {}]   ;;  %s877_s5 = inlined_call_operand.hbm [shape: bf16[128,128], index: 5, kind: input, shape index: {}]   ;;  %s878_s6 = inlined_call_operand.vmem [shape: f32[1,128], index: 6, kind: input, shape index: {}]   ;;  %s879_s7 = inlined_call_operand.hbm [shape: bf16[128,128], index: 7, kind: input, shape index: {}]   ;;  %s880_s8 = inlined_call_operand.vmem [shape: f32[1,128], index: 8, kind: input, shape index: {}]   ;;  %s881_s9 = inlined_call_operand.hbm [shape: f32[8,128], index: 9, kind: output, shape index: {}]  }
   0x1   :  { %15 = vsyncpa [#allocation6], 0 }
   0x2   :  { %16 = vsyncpa [#allocation9], 0  ;;  %s33_s11 = sshll.u32 %s873_s1, 4  ;;  %s34_s11 = int_to_ptr.hbm [resolvable:$true] %s33_s11 }
   0x3   :  { %17 = vsyncpa [#allocation4], 0  ;;  %s784_s12 = smov [#allocation5]   ;;  %s63_s16 = sshll.u32 %s877_s5, 4  ;;  %s64_s16 = int_to_ptr.hbm [resolvable:$true] %s63_s16 }
   0x4   :  { %s35_s13 = sshll.u32 %s784_s12, 4  ;;  %s785_s17 = smov 64   ;;  %s36_s13 = int_to_ptr.vmem [resolvable:$true] %s35_s13 }
   0x5   :  { %s786_s18 = smov 4   ;;  %s787_s19 = smov [#allocation8]  }
   0x6   :  { %41 = dma.hbm_to_vmem [thread:$0]  %s34_s11, 1024, %s36_s13, [#allocation6], %s785_s17, %s785_s17, %s786_s18  }
   0x7   :  { %s65_s20 = sshll.u32 %s787_s19, 4  ;;  %s23_s23 = sshll.u32 %s872_s0, 4  ;;  %s66_s20 = int_to_ptr.vmem [resolvable:$true] %s65_s20  ;;  %s24_s23 = int_to_ptr.hbm [resolvable:$true] %s23_s23 }
   0x8   :  { %71 = dma.hbm_to_vmem [thread:$0]  %s64_s16, 1024, %s66_s20, [#allocation9], %s785_s17, %s785_s17, %s786_s18  }
   0x9   :  { %s48_s25 = sshll.u32 %s875_s3, 4  ;;  %s788_s26 = smov [#allocation2]   ;;  %s49_s25 = int_to_ptr.hbm [resolvable:$true] %s48_s25 }
   0xa   :  { %s25_s27 = sshll.u32 %s788_s26, 4  ;;  %s789_s5 = smov [#allocation7]   ;;  %s26_s27 = int_to_ptr.vmem [resolvable:$true] %s25_s27 }
   0xb   :  { %28 = dma.hbm_to_vmem [thread:$0]  %s24_s23, 64, %s26_s27, [#allocation3]  }
   0xc   :  { %s50_s28 = sshll.u32 %s789_s5, 4  ;;  %s78_s10 = sshll.u32 %s879_s7, 4  ;;  %s51_s28 = int_to_ptr.vmem [resolvable:$true] %s50_s28  ;;  %s79_s10 = int_to_ptr.hbm [resolvable:$true] %s78_s10 }
   0xd   :  { %56 = dma.hbm_to_vmem [thread:$0]  %s49_s25, 1024, %s51_s28, [#allocation6], %s785_s17, %s785_s17, %s786_s18  }
   0xe   :  { %s790_s0 = smov [#allocation10]  }
   0xf   :  { %s80_s11 = sshll.u32 %s790_s0, 4  ;;  %s81_s11 = int_to_ptr.vmem [resolvable:$true] %s80_s11 }
  0x10   :  { %86 = dma.hbm_to_vmem [thread:$0]  %s79_s10, 1024, %s81_s11, [#allocation9], %s785_s17, %s785_s17, %s786_s18  }
  0x11   :  { %776 = dma.done.wait [#allocation3], 64  }
  0x12   :  { %777 = vsyncadd [#allocation3], 4294967232 }
  0x13   :  { %778 = dma.done.wait [#allocation6], 2048  }
  0x14   :  { %779 = vsyncadd [#allocation6], 4294965248 }
  0x15   :  { %780 = dma.done.wait [#allocation9], 2048  }
  0x16   :  { %781 = vsyncadd [#allocation9], 4294965248  ;;  %v595_v0 = vld [vmem:[#allocation5 + $0x38] sm:$0xff]  ;;  %v594_v1 = vld [vmem:[#allocation5 + $0x30] sm:$0xff]  ;;  %s791_s16 = smov [#allocation11]   ;;  %s448_s20 = sshll.u32 %s881_s9, 4  ;;  %s449_s20 = int_to_ptr.hbm [resolvable:$true] %s448_s20 }
  0x17   :  { %178 = vmatpush.bf16.msra.mxu0 %v595_v0  ;;  %v603_v2 = vld [vmem:[#allocation7 + $0x38] sm:$0xff]  ;;  %v602_v3 = vld [vmem:[#allocation7 + $0x30] sm:$0xff]  ;;  %v593_v4 = vld [vmem:[#allocation5 + $0x28] sm:$0xff]  ;;  %s446_s17 = sshll.u32 %s791_s16, 4  ;;  %s447_s17 = int_to_ptr.vmem [resolvable:$true] %s446_s17 }
  0x18   :  { %261 = vmatpush.bf16.msra.mxu1 %v603_v2  ;;  %v601_v5 = vld [vmem:[#allocation7 + $0x28] sm:$0xff]  ;;  %v592_v6 = vld [vmem:[#allocation5 + $0x20] sm:$0xff]  ;;  %v591_v8 = vld [vmem:[#allocation5 + $0x18] sm:$0xff] }
  0x19   :  { %v600_v7 = vld [vmem:[#allocation7 + $0x20] sm:$0xff]  ;;  %v599_v9 = vld [vmem:[#allocation7 + $0x18] sm:$0xff]  ;;  %v590_v10 = vld [vmem:[#allocation5 + $0x10] sm:$0xff] }
  0x1a   :  { %v598_v11 = vld [vmem:[#allocation7 + $0x10] sm:$0xff]  ;;  %v589_v12 = vld [vmem:[#allocation5 + $0x8] sm:$0xff]  ;;  %v588_v13 = vld [vmem:[#allocation5] sm:$0xff] }
  0x1b   :  { %179 = vmatpush.bf16.msra.mxu0 %v594_v1  ;;  %v109_v14 = vld [vmem:[#allocation2] sm:$0xf]  ;;  %v597_v15 = vld [vmem:[#allocation7 + $0x8] sm:$0xff]  ;;  %v596_v16 = vld [vmem:[#allocation7] sm:$0xff] }
  0x1c   :  { %262 = vmatpush.bf16.msra.mxu1 %v602_v3  ;;  %v611_v17 = vld [vmem:[#allocation8 + $0x38] sm:$0xff]  ;;  %v610_v18 = vld [vmem:[#allocation8 + $0x30] sm:$0xff]  ;;  %v609_v19 = vld [vmem:[#allocation8 + $0x28] sm:$0xff] }
  0x1d   :  { %344 = vmatpush.bf16.msra.mxu2 %v611_v17  ;;  %v608_v20 = vld [vmem:[#allocation8 + $0x20] sm:$0xff]  ;;  %v607_v21 = vld [vmem:[#allocation8 + $0x18] sm:$0xff]  ;;  %v606_v22 = vld [vmem:[#allocation8 + $0x10] sm:$0xff] }
  0x1e   :  { %v628_v23 = vld [vmem:[%s874_s2] ss:$0 sm:$0xff]  ;;  %v605_v29 = vld [vmem:[#allocation8 + $0x8] sm:$0xff]  ;;  %v604_v30 = vld [vmem:[#allocation8] sm:$0xff] }
  0x1f   :  { %180 = vmatpush.bf16.msra.mxu0 %v593_v4  ;;  %v619_v31 = vld [vmem:[#allocation10 + $0x38] sm:$0xff]  ;;  %v618_v32 = vld [vmem:[#allocation10 + $0x30] sm:$0xff]  ;;  %v617_v33 = vld [vmem:[#allocation10 + $0x28] sm:$0xff] }
  0x20   :  { %263 = vmatpush.bf16.msra.mxu1 %v601_v5  ;;  %427 = vmatpush.bf16.msra.mxu3 %v619_v31  ;;  %v616_v34 = vld [vmem:[#allocation10 + $0x20] sm:$0xff]  ;;  %v615_v35 = vld [vmem:[#allocation10 + $0x18] sm:$0xff]  ;;  %v614_v36 = vld [vmem:[#allocation10 + $0x10] sm:$0xff] }
  0x21   :  { %345 = vmatpush.bf16.msra.mxu2 %v610_v18  ;;  %v629_v37 = vld [vmem:[%s876_s4] ss:$0 sm:$0xff]  ;;  %v613_v43 = vld [vmem:[#allocation10 + $0x8] sm:$0xff]  ;;  %v612_v44 = vld [vmem:[#allocation10] sm:$0xff] }
  0x22   :  { %v630_v45 = vld [vmem:[%s878_s6] ss:$0 sm:$0xff] }
  0x23   :  { %181 = vmatpush.bf16.msra.mxu0 %v592_v6  ;;  %v631_v51 = vld [vmem:[%s880_s8] ss:$0 sm:$0xff] }
  0x24   :  { %264 = vmatpush.bf16.msra.mxu1 %v600_v7  ;;  %428 = vmatpush.bf16.msra.mxu3 %v618_v32 }
  0x25   :  { %346 = vmatpush.bf16.msra.mxu2 %v609_v19 }
  0x27   :  { %182 = vmatpush.bf16.msra.mxu0 %v591_v8 }
  0x28   :  { %265 = vmatpush.bf16.msra.mxu1 %v599_v9  ;;  %429 = vmatpush.bf16.msra.mxu3 %v617_v33 }
  0x29   :  { %347 = vmatpush.bf16.msra.mxu2 %v608_v20 }
  0x2b   :  { %183 = vmatpush.bf16.msra.mxu0 %v590_v10 }
  0x2c   :  { %266 = vmatpush.bf16.msra.mxu1 %v598_v11  ;;  %430 = vmatpush.bf16.msra.mxu3 %v616_v34 }
  0x2d   :  { %348 = vmatpush.bf16.msra.mxu2 %v607_v21 }
  0x2f   :  { %184 = vmatpush.bf16.msra.mxu0 %v589_v12 }
  0x30   :  { %267 = vmatpush.bf16.msra.mxu1 %v597_v15  ;;  %431 = vmatpush.bf16.msra.mxu3 %v615_v35 }
  0x31   :  { %349 = vmatpush.bf16.msra.mxu2 %v606_v22 }
  0x33   :  { %185 = vmatpush.bf16.msra.mxu0 %v588_v13 }
  0x34   :  { %268 = vmatpush.bf16.msra.mxu1 %v596_v16  ;;  %432 = vmatpush.bf16.msra.mxu3 %v614_v36 }
  0x35   :  { %350 = vmatpush.bf16.msra.mxu2 %v605_v29 }
  0x36   :  { %186 = vmatmul.bf16.vlgmr.msra.gmra.mxu0 %v109_v14 }
  0x38   :  { %433 = vmatpush.bf16.msra.mxu3 %v613_v43 }
  0x39   :  { %351 = vmatpush.bf16.msra.mxu2 %v604_v30 }
  0x3c   :  { %434 = vmatpush.bf16.msra.mxu3 %v612_v44 }
  0xb3   :  { %v187_v24 = vpop.f32.mrf.mxu0 }
  0xb4   :  { %v188_v25 = vadd.f32 %v628_v23, %v187_v24 }
  0xb6   :  { %v191_v26 = vmax.f32 %v188_v25, 0.0 }
  0xb8   :  { %v209_v27 = vpack.c.bf16 %v191_v26, %v191_v26 }
  0xba   :  { %269 = vmatmul.bf16.vlgmr.msra.gmra.mxu1 %v209_v27 }
  0xbb   :  { %v189_v28 = vpop.f32.mrf.mxu0 }
 0x137   :  { %v270_v38 = vpop.f32.mrf.mxu1 }
 0x138   :  { %v271_v39 = vadd.f32 %v629_v37, %v270_v38 }
 0x13a   :  { %v274_v40 = vmax.f32 %v271_v39, 0.0 }
 0x13c   :  { %v292_v41 = vpack.c.bf16 %v274_v40, %v274_v40 }
 0x13e   :  { %352 = vmatmul.bf16.vlgmr.msra.gmra.mxu2 %v292_v41 }
 0x13f   :  { %v272_v42 = vpop.f32.mrf.mxu1 }
 0x1c1   :  { %v353_v46 = vpop.f32.mrf.mxu2 }
 0x1c2   :  { %v354_v47 = vadd.f32 %v630_v45, %v353_v46 }
 0x1c4   :  { %v357_v48 = vmax.f32 %v354_v47, 0.0 }
 0x1c6   :  { %v375_v49 = vpack.c.bf16 %v357_v48, %v357_v48 }
 0x1c8   :  { %435 = vmatmul.bf16.vlgmr.msra.gmra.mxu3 %v375_v49 }
 0x1c9   :  { %v355_v50 = vpop.f32.mrf.mxu2 }
 0x24b   :  { %v436_v52 = vpop.f32.mrf.mxu3 }
 0x24c   :  { %v437_v53 = vadd.f32 %v631_v51, %v436_v52 }
 0x24e   :  { %440 = vst [vmem:[#allocation11] sm:$0xff] %v437_v53 }
 0x24f   :  { %451 = dma.vmem_to_hbm [thread:$0]  %s447_s17, 128, %s449_s20, [#allocation4]  }
 0x253   :  { %v438_v54 = vpop.f32.mrf.mxu3 }
 0x254   :  { %782 = dma.done.wait [#allocation4], 128  }
 0x255   :  { %783 = vsyncadd [#allocation4], 4294967168 }
 0x256   :  { %456 = vsyncpa [#allocation3], 1 }
 0x257   :  { %457 = vsyncpa [#allocation6], 1 }
 0x258   :  { %458 = vsyncpa [#allocation9], 1 }
 0x259   :  { %459 = vsyncpa [#allocation4], 1 }

</bundles_post_ra>
